<compile_context>
chip_gen: v7x
topology: tpu7x:2x2x1
jax: 0.10.0
libtpu: 0.0.40
codegen_flags: <defaults>
</compile_context>

<pallas_src>
import functools

import jax
import jax.numpy as jnp
from jax import lax
from jax.experimental import pallas as pl
from jax.experimental.pallas import tpu as pltpu


# ----------------------------- configuration --------------------------------
EMBEDDING_SIZE = 8
ENTROPY_FEATURE_SIZE = 6
REF_FEATURE_SIZE = 4
HIDDEN = 32                      # inner layer width of all four MLPs

D_IN = 2 + EMBEDDING_SIZE        # [temperature, entropy, embedding]
FEAT = 16                        # padded feature block: RF + EF + RF (=14) -> 16


# ------------------------------- the kernel ---------------------------------
def _model0_kernel(
    x_ref,      # [D_IN, tb]    transposed input tile (batch on lanes)
    w1t_ref,    # [4H, D_IN]    block-diag layer-1 of all four nets (transposed)
    b1t_ref,    # [4H, 1]
    wh_ref,     # [2*FEAT, 4H]  layer-2 of rf/ef/rp nets + duplicated p_ref block
    bh_ref,     # [2*FEAT, 1]   matching biases (pn_b2 pre-folded into rows 20:26)
    pnp_ref,    # [H, FEAT]     parameter_net layer-1, p_ref part (zero-padded cols)
    pnw2_ref,   # [FEAT, H]     parameter_net layer-2 (zero-padded rows)
    out_ref,    # [1, tb]       lane-dense output
):
    x = x_ref[...]                                                    # [10, tb]

    # Fused layer-1 of all four nets: one MXU matmul, M=128, K=10.
    h_raw = jnp.dot(w1t_ref[...], x,
                    preferred_element_type=jnp.float32) + b1t_ref[...]  # [128, tb]
    h = jnp.maximum(h_raw, 0.0)

    # Fused layer-2 of ref_feature / entropy_feature / ref_parameter nets plus a
    # duplicated p_ref block, one MXU matmul -> [32, tb]:
    #   rows  0:4   x_ref        rows  4:10  x_entropy   rows 10:14  p_ref
    #   rows 14:16  0
    #   rows 16:20  p_ref        rows 20:26  pn_b2 (p_entropy bias)  rows 26:32 0
    res = jnp.dot(wh_ref[...], h,
                  preferred_element_type=jnp.float32) + bh_ref[...]     # [32, tb]
    feat = res[0:FEAT, :]           # [x_ref | x_entropy | p_ref | 0]   [16, tb]
    pf = res[FEAT:2 * FEAT, :]      # [p_ref | pn_b2     |   0       ]  [16, tb]

    # parameter_net layer-1: embedding part is already in h_raw[:H] (un-ReLU'd);
    # add the p_ref part via a zero-padded K=16 matmul (no slicing of feat).
    hp = h_raw[0:HIDDEN, :] + jnp.dot(pnp_ref[...], feat,
                                      preferred_element_type=jnp.float32)
    hp = jnp.maximum(hp, 0.0)                                           # [32, tb]

    # parameter_net layer-2 lands in rows RF:RF+EF, aligned with x_entropy.
    p_full = pf + jnp.dot(pnw2_ref[...], hp,
                          preferred_element_type=jnp.float32)           # [16, tb]

    # Merged weighted sum: rows 0:4 -> p_ref*x_ref, 4:10 -> p_entropy*x_entropy,
    # rows 10:16 contribute zero.  One multiply + one sublane reduction.
    out_ref[...] = jnp.sum(feat * p_full, axis=0, keepdims=True)        # [1, tb]


# ------------------------- static weight packing -----------------------------
def _pack_params(params):
    """Fuse the four tiny MLPs into transposed block-diagonal weights (XLA, once)."""
    E, RF, EF, H = EMBEDDING_SIZE, REF_FEATURE_SIZE, ENTROPY_FEATURE_SIZE, HIDDEN

    # layer-1 of all four nets -> one [4H, D_IN] block matrix (transposed).
    # row blocks: [0:H)   parameter_net (embedding part, NOT relu'd in kernel)
    #             [H:2H)  ref_feature_net      (col 0 = temperature)
    #             [2H:3H) entropy_feature_net  (col 1 = entropy)
    #             [3H:4H) ref_parameter_net    (cols 2: = embedding)
    w1t = jnp.zeros((4 * H, D_IN), jnp.float32)
    w1t = w1t.at[0 * H:1 * H, 2:].set(params["pn_w1"][:E].T)
    w1t = w1t.at[1 * H:2 * H, 0].set(params["rf_w1"][0])
    w1t = w1t.at[2 * H:3 * H, 1].set(params["ef_w1"][0])
    w1t = w1t.at[3 * H:4 * H, 2:].set(params["rp_w1"].T)
    b1t = jnp.concatenate(
        [params["pn_b1"], params["rf_b1"], params["ef_b1"], params["rp_b1"]],
        axis=1).T                                                   # [4H, 1]

    # layer-2 of rf/ef/rp nets + duplicated p_ref block -> [2*FEAT, 4H].
    wh = jnp.zeros((2 * FEAT, 4 * H), jnp.float32)
    wh = wh.at[0:RF, 1 * H:2 * H].set(params["rf_w2"].T)                 # x_ref
    wh = wh.at[RF:RF + EF, 2 * H:3 * H].set(params["ef_w2"].T)           # x_entropy
    wh = wh.at[RF + EF:2 * RF + EF, 3 * H:4 * H].set(params["rp_w2"].T)  # p_ref
    wh = wh.at[FEAT:FEAT + RF, 3 * H:4 * H].set(params["rp_w2"].T)       # p_ref (dup)

    bh = jnp.zeros((2 * FEAT, 1), jnp.float32)
    bh = bh.at[0:RF, 0].set(params["rf_b2"][0])
    bh = bh.at[RF:RF + EF, 0].set(params["ef_b2"][0])
    bh = bh.at[RF + EF:2 * RF + EF, 0].set(params["rp_b2"][0])
    bh = bh.at[FEAT:FEAT + RF, 0].set(params["rp_b2"][0])
    bh = bh.at[FEAT + RF:FEAT + RF + EF, 0].set(params["pn_b2"][0])  # pre-folded

    # parameter_net layer-1, p_ref part: [H, FEAT], only cols RF+EF:2RF+EF active.
    pnp = jnp.zeros((H, FEAT), jnp.float32)
    pnp = pnp.at[:, RF + EF:2 * RF + EF].set(params["pn_w1"][E:].T)

    # parameter_net layer-2: [FEAT, H], rows RF:RF+EF active (aligned w/ x_entropy).
    pnw2 = jnp.zeros((FEAT, H), jnp.float32)
    pnw2 = pnw2.at[RF:RF + EF, :].set(params["pn_w2"].T)

    return w1t, b1t, wh, bh, pnp, pnw2


# ------------------------------- the wrapper ---------------------------------
@functools.partial(jax.jit, static_argnames=("tb",))
def model0_ci_forward(x, params, *, tb=256):
    """x: [B, 2 + embedding_size] float32 -> [B, 1] float32."""
    B, d_in = x.shape
    assert d_in == D_IN
    assert tb % 128 == 0

    packed = _pack_params(params)

    # Transpose so the batch dim sits on lanes (one XLA transpose pass), then pad
    # the batch up to a multiple of the tile (padded columns are discarded).
    b_pad = ((B + tb - 1) // tb) * tb
    xt = x.T                                                        # [D_IN, B]
    if b_pad != B:
        xt = jnp.pad(xt, ((0, 0), (0, b_pad - B)))
    grid = (b_pad // tb,)

    x_spec = pl.BlockSpec((D_IN, tb), lambda i: (0, i))
    w_specs = [pl.BlockSpec(w.shape, lambda i: (0, 0)) for w in packed]
    out_spec = pl.BlockSpec((1, tb), lambda i: (0, i))

    out = pl.pallas_call(
        _model0_kernel,
        out_shape=jax.ShapeDtypeStruct((1, b_pad), jnp.float32),
        grid=grid,
        in_specs=[x_spec] + w_specs,
        out_specs=out_spec,
        compiler_params=pltpu.CompilerParams(
            dimension_semantics=("parallel",),
        ),
    )(xt, *packed)
    # [1, b_pad] row-major -> [b_pad, 1] is a free reshape; drop the padding.
    return out.reshape(b_pad, 1)[:B]


# --------------------------- deterministic params ----------------------------
def init_params(key):
    """Deterministic init matching torch.nn.Linear default (U(-1/sqrt(fan_in), +))."""
    def linear(key, fan_in, fan_out):
        kw, kb = jax.random.split(key)
        bound = 1.0 / (fan_in ** 0.5)
        w = jax.random.uniform(kw, (fan_in, fan_out), jnp.float32, -bound, bound)
        b = jax.random.uniform(kb, (1, fan_out), jnp.float32, -bound, bound)
        return w, b

    keys = jax.random.split(key, 8)
    p = {}
    # ref_feature_net: 1 -> H -> RF
    p["rf_w1"], p["rf_b1"] = linear(keys[0], 1, HIDDEN)
    p["rf_w2"], p["rf_b2"] = linear(keys[1], HIDDEN, REF_FEATURE_SIZE)
    # entropy_feature_net: 1 -> H -> EF
    p["ef_w1"], p["ef_b1"] = linear(keys[2], 1, HIDDEN)
    p["ef_w2"], p["ef_b2"] = linear(keys[3], HIDDEN, ENTROPY_FEATURE_SIZE)
    # ref_parameter_net: E -> H -> RF
    p["rp_w1"], p["rp_b1"] = linear(keys[4], EMBEDDING_SIZE, HIDDEN)
    p["rp_w2"], p["rp_b2"] = linear(keys[5], HIDDEN, REF_FEATURE_SIZE)
    # parameter_net: E + RF -> H -> EF
    p["pn_w1"], p["pn_b1"] = linear(keys[6], EMBEDDING_SIZE + REF_FEATURE_SIZE, HIDDEN)
    p["pn_w2"], p["pn_b2"] = linear(keys[7], HIDDEN, ENTROPY_FEATURE_SIZE)
    return p


# ------------------------ pure-JAX reference (for check) ---------------------
def reference_forward(x, params):
    hi = lax.Precision.HIGHEST

    def dot(a, b):
        return jnp.dot(a, b, precision=hi)

    temperature = x[:, 0:1]
    entropy = x[:, 1:2]
    embedding = x[:, 2:]

    h = jnp.maximum(dot(temperature, params["rf_w1"]) + params["rf_b1"], 0.0)
    x_ref = dot(h, params["rf_w2"]) + params["rf_b2"]

    h = jnp.maximum(dot(entropy, params["ef_w1"]) + params["ef_b1"], 0.0)
    x_entropy = dot(h, params["ef_w2"]) + params["ef_b2"]

    h = jnp.maximum(dot(embedding, params["rp_w1"]) + params["rp_b1"], 0.0)
    p_ref = dot(h, params["rp_w2"]) + params["rp_b2"]

    p_in = jnp.concatenate([embedding, p_ref], axis=1)
    h = jnp.maximum(dot(p_in, params["pn_w1"]) + params["pn_b1"], 0.0)
    p_entropy = dot(h, params["pn_w2"]) + params["pn_b2"]

    v_entropy = jnp.sum(p_entropy * x_entropy, axis=1)
    v_ref = jnp.sum(p_ref * x_ref, axis=1)
    return (v_entropy + v_ref)[:, None]


# ----------------------------------- main ------------------------------------
if __name__ == "__main__":
    key = jax.random.PRNGKey(0)
    k_params, k_x = jax.random.split(key)

    params = init_params(k_params)

    # batch chosen so the grid has several tiles (tb=256 -> grid 4) and
    # exercises the batch-padding path.
    batch = 1000
    x = jax.random.uniform(
        k_x, (batch, D_IN), jnp.float32, minval=0.1, maxval=1.0
    )

    out = model0_ci_forward(x, params)
    out = jax.block_until_ready(out)

    ref = reference_forward(x, params)
    assert out.shape == (batch, 1), out.shape
    ok = jnp.allclose(out, ref, atol=1e-4, rtol=1e-4)
    assert bool(ok), (out[:4], ref[:4])

    print("KERNEL_OK")
</pallas_src>

<mosaic_0001>
module attributes {stable_mosaic.version = 11 : i64} {
  func.func @_model0_kernel(%arg0: i32, %arg1: memref<10x256xf32, #tpu.memory_space<vmem>>, %arg2: memref<128x10xf32, #tpu.memory_space<vmem>>, %arg3: memref<128x1xf32, #tpu.memory_space<vmem>>, %arg4: memref<32x128xf32, #tpu.memory_space<vmem>>, %arg5: memref<32x1xf32, #tpu.memory_space<vmem>>, %arg6: memref<32x16xf32, #tpu.memory_space<vmem>>, %arg7: memref<16x32xf32, #tpu.memory_space<vmem>>, %arg8: memref<1x256xf32, #tpu.memory_space<vmem>>) attributes {dimension_semantics = [#tpu.dimension_semantics<parallel>], iteration_bounds = array<i64: 4>, scalar_prefetch = 0 : i64, scratch_operands = 0 : i64, tpu.core_type = #tpu.core_type<tc>, window_params = [{transform_indices = @transform_0, window_bounds = array<i64: 10, 256>}, {pipeline_mode = #tpu.pipeline_mode<synchronous>, transform_indices = @transform_1, window_bounds = array<i64: 128, 10>}, {pipeline_mode = #tpu.pipeline_mode<synchronous>, transform_indices = @transform_2, window_bounds = array<i64: 128, 1>}, {pipeline_mode = #tpu.pipeline_mode<synchronous>, transform_indices = @transform_3, window_bounds = array<i64: 32, 128>}, {pipeline_mode = #tpu.pipeline_mode<synchronous>, transform_indices = @transform_4, window_bounds = array<i64: 32, 1>}, {pipeline_mode = #tpu.pipeline_mode<synchronous>, transform_indices = @transform_5, window_bounds = array<i64: 32, 16>}, {pipeline_mode = #tpu.pipeline_mode<synchronous>, transform_indices = @transform_6, window_bounds = array<i64: 16, 32>}, {transform_indices = @transform_7, window_bounds = array<i64: 1, 256>}]} {
    %c0 = arith.constant 0 : index
    %c0_0 = arith.constant 0 : index
    %0 = vector.load %arg1[%c0, %c0_0] : memref<10x256xf32, #tpu.memory_space<vmem>>, vector<10x256xf32>
    %c0_1 = arith.constant 0 : index
    %c0_2 = arith.constant 0 : index
    %1 = vector.load %arg2[%c0_1, %c0_2] : memref<128x10xf32, #tpu.memory_space<vmem>>, vector<128x10xf32>
    %cst = arith.constant dense<0.000000e+00> : vector<128x256xf32>
    %2 = tpu.matmul %1, %0, %cst {dimension_numbers = #tpu.dot_dimension_numbers<[1], [0], [0], [1], [0, 0, 1, 1], [], []>} : vector<128x10xf32>, vector<10x256xf32>, vector<128x256xf32> -> vector<128x256xf32>
    %c0_3 = arith.constant 0 : index
    %c0_4 = arith.constant 0 : index
    %3 = vector.load %arg3[%c0_3, %c0_4] : memref<128x1xf32, #tpu.memory_space<vmem>>, vector<128x1xf32>
    %4 = vector.broadcast %3 : vector<128x1xf32> to vector<128x256xf32>
    %5 = arith.addf %2, %4 : vector<128x256xf32>
    %cst_5 = arith.constant 0.000000e+00 : f32
    %6 = vector.broadcast %cst_5 : f32 to vector<128x256xf32>
    %7 = arith.maximumf %5, %6 : vector<128x256xf32>
    %c0_6 = arith.constant 0 : index
    %c0_7 = arith.constant 0 : index
    %8 = vector.load %arg4[%c0_6, %c0_7] : memref<32x128xf32, #tpu.memory_space<vmem>>, vector<32x128xf32>
    %cst_8 = arith.constant dense<0.000000e+00> : vector<32x256xf32>
    %9 = tpu.matmul %8, %7, %cst_8 {dimension_numbers = #tpu.dot_dimension_numbers<[1], [0], [0], [1], [0, 0, 1, 1], [], []>} : vector<32x128xf32>, vector<128x256xf32>, vector<32x256xf32> -> vector<32x256xf32>
    %c0_9 = arith.constant 0 : index
    %c0_10 = arith.constant 0 : index
    %10 = vector.load %arg5[%c0_9, %c0_10] : memref<32x1xf32, #tpu.memory_space<vmem>>, vector<32x1xf32>
    %11 = vector.broadcast %10 : vector<32x1xf32> to vector<32x256xf32>
    %12 = arith.addf %9, %11 : vector<32x256xf32>
    %13 = vector.extract_strided_slice %12 {offsets = [0, 0], sizes = [16, 256], strides = [1, 1]} : vector<32x256xf32> to vector<16x256xf32>
    %14 = vector.extract_strided_slice %12 {offsets = [16, 0], sizes = [16, 256], strides = [1, 1]} : vector<32x256xf32> to vector<16x256xf32>
    %15 = vector.extract_strided_slice %5 {offsets = [0, 0], sizes = [32, 256], strides = [1, 1]} : vector<128x256xf32> to vector<32x256xf32>
    %c0_11 = arith.constant 0 : index
    %c0_12 = arith.constant 0 : index
    %16 = vector.load %arg6[%c0_11, %c0_12] : memref<32x16xf32, #tpu.memory_space<vmem>>, vector<32x16xf32>
    %cst_13 = arith.constant dense<0.000000e+00> : vector<32x256xf32>
    %17 = tpu.matmul %16, %13, %cst_13 {dimension_numbers = #tpu.dot_dimension_numbers<[1], [0], [0], [1], [0, 0, 1, 1], [], []>} : vector<32x16xf32>, vector<16x256xf32>, vector<32x256xf32> -> vector<32x256xf32>
    %18 = arith.addf %15, %17 : vector<32x256xf32>
    %cst_14 = arith.constant 0.000000e+00 : f32
    %19 = vector.broadcast %cst_14 : f32 to vector<32x256xf32>
    %20 = arith.maximumf %18, %19 : vector<32x256xf32>
    %c0_15 = arith.constant 0 : index
    %c0_16 = arith.constant 0 : index
    %21 = vector.load %arg7[%c0_15, %c0_16] : memref<16x32xf32, #tpu.memory_space<vmem>>, vector<16x32xf32>
    %cst_17 = arith.constant dense<0.000000e+00> : vector<16x256xf32>
    %22 = tpu.matmul %21, %20, %cst_17 {dimension_numbers = #tpu.dot_dimension_numbers<[1], [0], [0], [1], [0, 0, 1, 1], [], []>} : vector<16x32xf32>, vector<32x256xf32>, vector<16x256xf32> -> vector<16x256xf32>
    %23 = arith.addf %14, %22 : vector<16x256xf32>
    %24 = arith.mulf %13, %23 : vector<16x256xf32>
    %cst_18 = arith.constant dense<0.000000e+00> : vector<256xf32>
    %25 = vector.multi_reduction <add>, %24, %cst_18 [0] : vector<16x256xf32> to vector<256xf32>
    %26 = vector.shape_cast %25 : vector<256xf32> to vector<1x256xf32>
    %c0_19 = arith.constant 0 : index
    %c0_20 = arith.constant 0 : index
    %27 = vector.load %arg8[%c0_19, %c0_20] : memref<1x256xf32, #tpu.memory_space<vmem>>, vector<1x256xf32>
    tpu.vector_store %arg8[%c0_19, %c0_20], %26 {strides = array<i32>} : memref<1x256xf32, #tpu.memory_space<vmem>>, vector<1x256xf32>,
    return
  }
  func.func @transform_0(%arg0: i32) -> (i32, i32) {
    %c0_i32 = arith.constant 0 : i32
    %c0_i32_0 = arith.constant 0 : i32
    return %c0_i32, %arg0 : i32, i32
  }
  func.func @transform_1(%arg0: i32) -> (i32, i32) {
    %c0_i32 = arith.constant 0 : i32
    %c0_i32_0 = arith.constant 0 : i32
    %c0_i32_1 = arith.constant 0 : i32
    return %c0_i32, %c0_i32_0 : i32, i32
  }
  func.func @transform_2(%arg0: i32) -> (i32, i32) {
    %c0_i32 = arith.constant 0 : i32
    %c0_i32_0 = arith.constant 0 : i32
    %c0_i32_1 = arith.constant 0 : i32
    return %c0_i32, %c0_i32_0 : i32, i32
  }
  func.func @transform_3(%arg0: i32) -> (i32, i32) {
    %c0_i32 = arith.constant 0 : i32
    %c0_i32_0 = arith.constant 0 : i32
    %c0_i32_1 = arith.constant 0 : i32
    return %c0_i32, %c0_i32_0 : i32, i32
  }
  func.func @transform_4(%arg0: i32) -> (i32, i32) {
    %c0_i32 = arith.constant 0 : i32
    %c0_i32_0 = arith.constant 0 : i32
    %c0_i32_1 = arith.constant 0 : i32
    return %c0_i32, %c0_i32_0 : i32, i32
  }
  func.func @transform_5(%arg0: i32) -> (i32, i32) {
    %c0_i32 = arith.constant 0 : i32
    %c0_i32_0 = arith.constant 0 : i32
    %c0_i32_1 = arith.constant 0 : i32
    return %c0_i32, %c0_i32_0 : i32, i32
  }
  func.func @transform_6(%arg0: i32) -> (i32, i32) {
    %c0_i32 = arith.constant 0 : i32
    %c0_i32_0 = arith.constant 0 : i32
    %c0_i32_1 = arith.constant 0 : i32
    return %c0_i32, %c0_i32_0 : i32, i32
  }
  func.func @transform_7(%arg0: i32) -> (i32, i32) {
    %c0_i32 = arith.constant 0 : i32
    %c0_i32_0 = arith.constant 0 : i32
    return %c0_i32, %arg0 : i32, i32
  }
}

</mosaic_0001>

<bundles_post_ra>
// kernel: model0_ci_forward.1
= control target key start
LH: loop header
LB: loop body
LE: loop exit
PB: predicated region body
PF: predicated region fallthrough
CT: control target
= control target key end

     0   :  { %s1289_s24 = smov 0   ;;  %s1291_s25 = smov 0   ;;  %s1569_s0 = inlined_call_operand.vmem [shape: f32[10,1024], index: 0, kind: input, shape index: {}]   ;;  %s1570_s1 = inlined_call_operand.vmem [shape: f32[128,10], index: 1, kind: input, shape index: {}]   ;;  %s1571_s2 = inlined_call_operand.vmem [shape: f32[128,1], index: 2, kind: input, shape index: {}]   ;;  %s1572_s3 = inlined_call_operand.vmem [shape: f32[32,128], index: 3, kind: input, shape index: {}]   ;;  %s1573_s4 = inlined_call_operand.vmem [shape: f32[32,1], index: 4, kind: input, shape index: {}]   ;;  %s1574_s5 = inlined_call_operand.vmem [shape: f32[32,16], index: 5, kind: input, shape index: {}]   ;;  %s1575_s6 = inlined_call_operand.vmem [shape: f32[16,32], index: 6, kind: input, shape index: {}]   ;;  %s1576_s7 = inlined_call_operand.vmem [shape: f32[1,1024], index: 7, kind: output, shape index: {}]  }
   0x1   :  { %s1293_s26 = smov 0  }
   0x2 LB: > { %s1096_s27 = sadd.s32 4294967295, %s1243_s26   ;;  %s1306_s28 = sadd.s32 1, %s1243_s26   ;;  %s1243_s26 = sphi %s1293_s26, %s1579_s26   ;;  %s1239_s25 = sphi %s1291_s25, %s1578_s25   ;;  %s1235_s24 = sphi %s1289_s24, %s1577_s24  }
   0x3   : > { %s21_s29 = ssub.s32 %s1243_s26, %s1306_s28  ;;  %s24_s30 = sadd.s32 1, %s1239_s25 }
   0x4   : > { %p22_p0 = scmp.eq.s32.totalorder %s21_s29, 0  ;;  %p31_p1 = scmp.ne.s32.totalorder %s1239_s25, %s1235_s24 }
   0x5   : > { %p32_p2 = scmp.eq.s32.totalorder %s1243_s26, 0  ;;  %p1099_p4 = scmp.ge.s32.totalorder %s1243_s26, 4 }
   0x6   : > { %s1315_s8 = scalar_select %p22_p0, %s1239_s25, %s24_s30  }
   0x7   : > { %p33_p3 = por %p32_p2, %p31_p1  ;;  %227 = sbr.rel (%p1099_p4) target bundleno = 21 (0x15), region = 40 }
   0xe   : > { %230 = sbr.rel (!%p33_p3) target bundleno = 21 (0x15), region = 44  ;;  %s232_s9 = sand.u32 (%p33_p3), 1, %s1239_s25  }
   0xf   : > { %s1132_s10 = sshll.u32 (%p33_p3), %s1243_s26, 4  ;;  %s1100_s11 = sshll.u32 (%p33_p3), %s232_s9, 5 }
  0x10   : > { %s237_s14 = scalar_lea.vmem (%p33_p3), %s1569_s0, %s1132_s10  ;;  %s234_s15 = scalar_lea.vmem (%p33_p3), [#allocation2], %s1100_s11 }
  0x11   : > { %v250_v0 = vld [vmem:[%s237_s14] sm:$0xff] (%p33_p3)  ;;  %v252_v1 = vld [vmem:[%s237_s14 + $0x8] sm:$0xff] (%p33_p3) }
  0x12   : > { %v254_v2 = vld [vmem:[%s237_s14 + $0x40] sm:$0xff] (%p33_p3)  ;;  %251 = vst [vmem:[%s234_s15] sm:$0xff] (%p33_p3), %v250_v0  ;;  %253 = vst [vmem:[%s234_s15 + $0x8] sm:$0xff] (%p33_p3), %v252_v1  ;;  %v256_v3 = vld [vmem:[%s237_s14 + $0x48] sm:$0xff] (%p33_p3) }
  0x13   : > { %255 = vst [vmem:[%s234_s15 + $0x10] sm:$0xff] (%p33_p3), %v254_v2  ;;  %257 = vst [vmem:[%s234_s15 + $0x18] sm:$0xff] (%p33_p3), %v256_v3 }
  0x15 PF: > { %p1103_p5 = scmp.ge.s32.totalorder %s1243_s26, 1  ;;  %p262_p6 = scmp.lt.s32.totalorder %s1243_s26, 5 }
  0x17   : > { %p263_p7 = pnand %p1103_p5, %p262_p6 }
  0x18   : > { %s269_s16 = sand.u32 (!%p263_p7), 1, %s1235_s24   ;;  %vm470_vm0 = vcmask (!%p263_p7), 1041408   ;;  %v1245_v4 = vmov (!%p263_p7), 0.0   ;;  %vm1246_vm1 = vmmov (!%p263_p7), 1   ;;  %v1247_v5 = vmov (!%p263_p7), 0   ;;  %v309_v12 = vld [vmem:[%s1570_s1] sm:$0xff] (!%p263_p7) }
  0x19   : > { %266 = sbr.rel (%p263_p7) target bundleno = 1019 (0x3fb), region = 67  ;;  %s1104_s17 = sshll.u32 (!%p263_p7), %s269_s16, 5  ;;  %541 = vmatprep.mubr.f32.mxu0 (!%p263_p7), %v1245_v4  ;;  %762 = vmatprep.mubr.f32.mxu1 (!%p263_p7), %v1245_v4  ;;  %vm1134_vm2 = vmpackc.low (!%p263_p7), %vm470_vm0, %vm1246_vm1  ;;  %vm421_vm3 = vcmask (!%p263_p7), 80896   ;;  %v325_v13 = vld [vmem:[%s1571_s2] sm:$0xff] (!%p263_p7)  ;;  %v327_v14 = vld [vmem:[%s1571_s2 + $0x10] sm:$0xff] (!%p263_p7)  ;;  %vm791_vm4 = vcmask (!%p263_p7), 130048  }
  0x1a   : > { %1219 = vset.pattern.permute.xlu0 (!%p263_p7), %v1247_v5  ;;  %1220 = vset.pattern.permute.xlu1 (!%p263_p7), %v1247_v5  ;;  %s271_s18 = scalar_lea.vmem (!%p263_p7), [#allocation2], %s1104_s17  ;;  %v326_v15 = vld [vmem:[%s1571_s2 + $0x8] sm:$0xff] (!%p263_p7)  ;;  %v328_v16 = vld [vmem:[%s1571_s2 + $0x18] sm:$0xff] (!%p263_p7)  ;;  %v329_v18 = vld [vmem:[%s1571_s2 + $0x20] sm:$0xff] (!%p263_p7)  ;;  %vm911_vm5 = vcmask (!%p263_p7), 261120   ;;  %s1105_s21 = sshll.u32 (!%p263_p7), %s1096_s27, 1 }
  0x1b   : > { %v306_v6 = vld [vmem:[%s271_s18 + $0x8] sm:$0xff] (!%p263_p7)  ;;  %v308_v7 = vld [vmem:[%s271_s18 + $0x18] sm:$0x3] (!%p263_p7)  ;;  %v305_v8 = vld [vmem:[%s271_s18] sm:$0xff] (!%p263_p7)  ;;  %343 = vperm.xlu0 (!%p263_p7), %1219, %v325_v13   ;;  %353 = vperm.xlu1 (!%p263_p7), %1220, %v327_v14   ;;  %p301_p8 = scmp.lt.s32.totalorder (!%p263_p7), %s1105_s21, 7 }
  0x1c   : > { %v1133_v9 = vpack.c.bf16 (!%p263_p7), %v308_v7, %v306_v6  ;;  %v307_v10 = vld [vmem:[%s271_s18 + $0x10] sm:$0x3] (!%p263_p7)  ;;  %v310_v17 = vld [vmem:[%s1570_s1 + $0x8] sm:$0xff] (!%p263_p7)  ;;  %v332_v22 = vld [vmem:[%s1571_s2 + $0x38] sm:$0xff] (!%p263_p7) }
  0x1d   : > { %v1136_v11 = vpack.c.bf16 (!%p263_p7), %v307_v10, %v305_v8  ;;  %v330_v19 = vld [vmem:[%s1571_s2 + $0x28] sm:$0xff] (!%p263_p7)  ;;  %v311_v20 = vld [vmem:[%s1570_s1 + $0x10] sm:$0xff] (!%p263_p7)  ;;  %v312_v23 = vld [vmem:[%s1570_s1 + $0x18] sm:$0xff] (!%p263_p7) }
  0x1e   : > { %1135 = vmatprep.subr.msk.bf16.mxu0 (!%p263_p7), %vm1134_vm2, %v1133_v9  ;;  %v331_v21 = vld [vmem:[%s1571_s2 + $0x30] sm:$0xff] (!%p263_p7)  ;;  %v333_v24 = vld [vmem:[%s1571_s2 + $0x40] sm:$0xff] (!%p263_p7)  ;;  %v334_v25 = vld [vmem:[%s1571_s2 + $0x48] sm:$0xff] (!%p263_p7) }
  0x1f   : > { %1138 = vmatpush1.bf16.msk.msra.mxu0 (!%p263_p7), %vm1134_vm2, %v1136_v11  ;;  %348 = vperm.xlu0 (!%p263_p7), %1219, %v326_v15   ;;  %v313_v26 = vld [vmem:[%s1570_s1 + $0x20] sm:$0xff] (!%p263_p7)  ;;  %v335_v27 = vld [vmem:[%s1571_s2 + $0x50] sm:$0xff] (!%p263_p7)  ;;  %v336_v28 = vld [vmem:[%s1571_s2 + $0x58] sm:$0xff] (!%p263_p7) }
  0x20   : > { %358 = vperm.xlu1 %1220, %v328_v16   ;;  %v314_v29 = vld [vmem:[%s1570_s1 + $0x28] sm:$0xff]  ;;  %v337_v30 = vld [vmem:[%s1571_s2 + $0x60] sm:$0xff]  ;;  %v315_v32 = vld [vmem:[%s1570_s1 + $0x30] sm:$0xff]  ;;  %s1581_s21 = smov (!%p301_p8, %s1105_s21), 7 }
  0x21   : > { %v338_v31 = vld [vmem:[%s1571_s2 + $0x68] sm:$0xff]  ;;  %v339_v33 = vld [vmem:[%s1571_s2 + $0x70] sm:$0xff]  ;;  %v340_v34 = vld [vmem:[%s1571_s2 + $0x78] sm:$0xff]  ;;  %s303_s24 = scalar_lea.vmem %s1576_s7, %s1581_s21 }
  0x22   : > { %1108 = vmatmul.mubr.msk.f32.vlgmr.msra.gmra.mrb[0].mxu0 %vm421_vm3, %v309_v12  ;;  %v316_v35 = vld [vmem:[%s1570_s1 + $0x38] sm:$0xff]  ;;  %v674_v36 = vld [vmem:[%s1573_s4] sm:$0xff]  ;;  %v675_v37 = vld [vmem:[%s1573_s4 + $0x8] sm:$0xff] }
  0x23   : > { %547 = vmatprep.mubr.f32.mxu0 %v1245_v4  ;;  %363 = vperm.xlu0 %1219, %v329_v18   ;;  %v317_v38 = vld [vmem:[%s1570_s1 + $0x40] sm:$0xff]  ;;  %v676_v39 = vld [vmem:[%s1573_s4 + $0x10] sm:$0xff]  ;;  %v677_v40 = vld [vmem:[%s1573_s4 + $0x18] sm:$0xff] }
  0x24   : > { %368 = vperm.xlu1 %1220, %v330_v19   ;;  %v318_v41 = vld [vmem:[%s1570_s1 + $0x48] sm:$0xff]  ;;  %v319_v42 = vld [vmem:[%s1570_s1 + $0x50] sm:$0xff]  ;;  %v320_v43 = vld [vmem:[%s1570_s1 + $0x58] sm:$0xff] }
  0x25   : > { %v321_v44 = vld [vmem:[%s1570_s1 + $0x60] sm:$0xff]  ;;  %v322_v45 = vld [vmem:[%s1570_s1 + $0x68] sm:$0xff]  ;;  %v323_v46 = vld [vmem:[%s1570_s1 + $0x70] sm:$0xff] }
  0x26   : > { %1109 = vmatmul.mubr.msk.f32.gmra.mrb[2].mxu0 %vm421_vm3, %v310_v17  ;;  %v324_v47 = vld [vmem:[%s1570_s1 + $0x78] sm:$0xff] }
  0x27   : > { %553 = vmatprep.mubr.f32.mxu0 %v1245_v4  ;;  %373 = vperm.xlu0 %1219, %v331_v21  }
  0x28   : > { %378 = vperm.xlu1 %1220, %v332_v22  }
  0x2a   : > { %1110 = vmatmul.mubr.msk.f32.gmra.mrb[4].mxu0 %vm421_vm3, %v311_v20 }
  0x2b   : > { %559 = vmatprep.mubr.f32.mxu0 %v1245_v4  ;;  %383 = vperm.xlu0 %1219, %v333_v24  }
  0x2c   : > { %388 = vperm.xlu1 %1220, %v334_v25  }
  0x2e   : > { %1111 = vmatmul.mubr.msk.f32.gmra.mrb[6].mxu0 %vm421_vm3, %v312_v23 }
  0x2f   : > { %565 = vmatprep.mubr.f32.mxu0 %v1245_v4  ;;  %393 = vperm.xlu0 %1219, %v335_v27  }
  0x30   : > { %398 = vperm.xlu1 %1220, %v336_v28  }
  0x32   : > { %1112 = vmatmul.mubr.msk.f32.gmra.mrb[8].mxu0 %vm421_vm3, %v313_v26 }
  0x33   : > { %571 = vmatprep.mubr.f32.mxu0 %v1245_v4  ;;  %403 = vperm.xlu0 %1219, %v337_v30  }
  0x34   : > { %408 = vperm.xlu1 %1220, %v338_v31  }
  0x36   : > { %1113 = vmatmul.mubr.msk.f32.gmra.mrb[10].mxu0 %vm421_vm3, %v314_v29 }
  0x37   : > { %577 = vmatprep.mubr.f32.mxu0 %v1245_v4  ;;  %413 = vperm.xlu0 %1219, %v339_v33  }
  0x38   : > { %418 = vperm.xlu1 %1220, %v340_v34  }
  0x3a   : > { %1114 = vmatmul.mubr.msk.f32.gmra.mrb[12].mxu0 %vm421_vm3, %v315_v32 }
  0x3b   : > { %583 = vmatprep.mubr.f32.mxu0 %v1245_v4  ;;  %680 = vperm.xlu0 %1219, %v674_v36  }
  0x3c   : > { %685 = vperm.xlu1 %1220, %v675_v37  }
  0x3e   : > { %1115 = vmatmul.mubr.msk.f32.gmra.mrb[14].mxu0 %vm421_vm3, %v316_v35 }
  0x3f   : > { %589 = vmatprep.mubr.f32.mxu0 %v1245_v4  ;;  %690 = vperm.xlu0 %1219, %v676_v39  }
  0x40   : > { %695 = vperm.xlu1 %1220, %v677_v40  }
  0x42   : > { %1116 = vmatmul.mubr.msk.f32.gmra.mrb[16].mxu0 %vm421_vm3, %v317_v38 }
  0x43   : > { %595 = vmatprep.mubr.f32.mxu0 %v1245_v4 }
  0x46   : > { %1117 = vmatmul.mubr.msk.f32.gmra.mrb[18].mxu0 %vm421_vm3, %v318_v41 }
  0x47   : > { %601 = vmatprep.mubr.f32.mxu0 %v1245_v4 }
  0x4a   : > { %1118 = vmatmul.mubr.msk.f32.gmra.mrb[20].mxu0 %vm421_vm3, %v319_v42 }
  0x4b   : > { %607 = vmatprep.mubr.f32.mxu0 %v1245_v4 }
  0x4e   : > { %1119 = vmatmul.mubr.msk.f32.gmra.mrb[22].mxu0 %vm421_vm3, %v320_v43 }
  0x4f   : > { %613 = vmatprep.mubr.f32.mxu0 %v1245_v4 }
  0x52   : > { %1120 = vmatmul.mubr.msk.f32.gmra.mrb[24].mxu0 %vm421_vm3, %v321_v44 }
  0x53   : > { %619 = vmatprep.mubr.f32.mxu0 %v1245_v4 }
  0x56   : > { %1121 = vmatmul.mubr.msk.f32.gmra.mrb[26].mxu0 %vm421_vm3, %v322_v45 }
  0x57   : > { %625 = vmatprep.mubr.f32.mxu0 %v1245_v4 }
  0x5a   : > { %1122 = vmatmul.mubr.msk.f32.gmra.mrb[28].mxu0 %vm421_vm3, %v323_v46 }
  0x5b   : > { %631 = vmatprep.mubr.f32.mxu0 %v1245_v4 }
  0x5e   : > { %1123 = vmatmul.mubr.msk.f32.gmra.mrb[30].mxu0 %vm421_vm3, %v324_v47 }
  0x9a   : > { %v344_v48 = vpop.permute.xlu0 %343  ;;  %v354_v57 = vpop.permute.xlu1 %353 }
  0x9e   : > { %v349_v51 = vpop.permute.xlu0 %348 }
  0x9f   : > { %v359_v3 = vpop.permute.xlu1 %358 }
  0xa2   : > { %v364_v17 = vpop.permute.xlu0 %363 }
  0xa3   : > { %v369_v21 = vpop.permute.xlu1 %368 }
  0xa6   : > { %v374_v34 = vpop.permute.xlu0 %373 }
  0xa7   : > { %v379_v37 = vpop.permute.xlu1 %378 }
  0xf5   : > { %v543_v49 = vpop.f32.mrb[0].mxu0 }
  0xf6   : > { %v545_v50 = vpop.f32.mrb[1].mxu0  ;;  %v1469_v54 = vadd.f32 %v543_v49, %v344_v48 }
  0xf7   : > { %v1467_v52 = vadd.f32 %v545_v50, %v344_v48  ;;  %v384_v50 = vpop.permute.xlu0 %383 }
  0xf8   : > { %v638_v63 = vmax.f32 %v1469_v54, 0.0 }
  0xf9   : > { %v549_v53 = vpop.f32.mrb[2].mxu0  ;;  %v639_v61 = vmax.f32 %v1467_v52, 0.0 }
  0xfa   : > { %v1471_v55 = vadd.f32 %v549_v53, %v349_v51  ;;  %v551_v56 = vpop.f32.mrb[3].mxu0 }
  0xfb   : > { %v1473_v58 = vadd.f32 %v551_v56, %v349_v51  ;;  %v389_v56 = vpop.permute.xlu1 %388 }
  0xfc   : > { %v640_v59 = vmax.f32 %v1471_v55, 0.0 }
  0xfd   : > { %v555_v60 = vpop.f32.mrb[4].mxu0  ;;  %v641_v62 = vmax.f32 %v1473_v58, 0.0 }
  0xfe   : > { %v557_v0 = vpop.f32.mrb[5].mxu0  ;;  %v1141_v2 = vpack.c.bf16 %v640_v59, %v638_v63  ;;  %v1481_v7 = vadd.f32 %v555_v60, %v354_v57 }
  0xff   : > { %v1139_v1 = vpack.c.bf16 %v641_v62, %v639_v61  ;;  %v1479_v5 = vadd.f32 %v557_v0, %v354_v57 }
 0x100   : > { %v642_v15 = vmax.f32 %v1481_v7, 0.0 }
 0x101   : > { %v561_v6 = vpop.f32.mrb[6].mxu0  ;;  %1140 = vmatprep.subr.bf16.mxu1 %v1139_v1  ;;  %v643_v12 = vmax.f32 %v1479_v5, 0.0 }
 0x102   : > { %v1483_v8 = vadd.f32 %v561_v6, %v359_v3  ;;  %v563_v9 = vpop.f32.mrb[7].mxu0  ;;  %1142 = vmatpush1.bf16.msra.mxu1 %v1141_v2 }
 0x103   : > { %v1485_v10 = vadd.f32 %v563_v9, %v359_v3 }
 0x104   : > { %v644_v11 = vmax.f32 %v1483_v8, 0.0 }
 0x105   : > { %v645_v13 = vmax.f32 %v1485_v10, 0.0  ;;  %v567_v14 = vpop.f32.mrb[8].mxu0 }
 0x106   : > { %v569_v16 = vpop.f32.mrb[9].mxu0  ;;  %v568_v19 = vadd.f32 %v567_v14, %v364_v17  ;;  %v1145_v20 = vpack.c.bf16 %v644_v11, %v642_v15  ;;  %v394_v11 = vpop.permute.xlu0 %393 }
 0x107   : > { %v1143_v18 = vpack.c.bf16 %v645_v13, %v643_v12  ;;  %v570_v22 = vadd.f32 %v569_v16, %v364_v17  ;;  %v399_v14 = vpop.permute.xlu1 %398 }
 0x108   : > { %v646_v27 = vmax.f32 %v568_v19, 0.0 }
 0x109   : > { %v573_v23 = vpop.f32.mrb[10].mxu0  ;;  %1144 = vmatprep.subr.bf16.mxu1 %v1143_v18  ;;  %v647_v29 = vmax.f32 %v570_v22, 0.0 }
 0x10a   : > { %v574_v24 = vadd.f32 %v573_v23, %v369_v21  ;;  %v575_v25 = vpop.f32.mrb[11].mxu0  ;;  %1146 = vmatpush1.bf16.msra.mxu1 %v1145_v20 }
 0x10b   : > { %v576_v26 = vadd.f32 %v575_v25, %v369_v21 }
 0x10c   : > { %v648_v28 = vmax.f32 %v574_v24, 0.0 }
 0x10d   : > { %v649_v30 = vmax.f32 %v576_v26, 0.0  ;;  %v579_v31 = vpop.f32.mrb[12].mxu0 }
 0x10e   : > { %v1149_v32 = vpack.c.bf16 %v648_v28, %v646_v27  ;;  %v581_v33 = vpop.f32.mrb[13].mxu0  ;;  %v580_v36 = vadd.f32 %v579_v31, %v374_v34  ;;  %v404_v27 = vpop.permute.xlu0 %403 }
 0x10f   : > { %v1147_v35 = vpack.c.bf16 %v649_v30, %v647_v29  ;;  %v582_v38 = vadd.f32 %v581_v33, %v374_v34  ;;  %v409_v30 = vpop.permute.xlu1 %408 }
 0x110   : > { %v650_v43 = vmax.f32 %v580_v36, 0.0 }
 0x111   : > { %v585_v39 = vpop.f32.mrb[14].mxu0  ;;  %1148 = vmatprep.subr.bf16.mxu1 %v1147_v35  ;;  %v651_v45 = vmax.f32 %v582_v38, 0.0 }
 0x112   : > { %v586_v40 = vadd.f32 %v585_v39, %v379_v37  ;;  %v587_v41 = vpop.f32.mrb[15].mxu0  ;;  %1150 = vmatpush1.bf16.msra.mxu1 %v1149_v32 }
 0x113   : > { %v588_v42 = vadd.f32 %v587_v41, %v379_v37 }
 0x114   : > { %v652_v44 = vmax.f32 %v586_v40, 0.0 }
 0x115   : > { %v653_v46 = vmax.f32 %v588_v42, 0.0  ;;  %v591_v47 = vpop.f32.mrb[16].mxu0 }
 0x116   : > { %v1153_v48 = vpack.c.bf16 %v652_v44, %v650_v43  ;;  %v593_v49 = vpop.f32.mrb[17].mxu0  ;;  %v592_v53 = vadd.f32 %v591_v47, %v384_v50  ;;  %v414_v43 = vpop.permute.xlu0 %413 }
 0x117   : > { %v1151_v51 = vpack.c.bf16 %v653_v46, %v651_v45  ;;  %v594_v57 = vadd.f32 %v593_v49, %v384_v50  ;;  %v419_v46 = vpop.permute.xlu1 %418 }
 0x118   : > { %v654_v63 = vmax.f32 %v592_v53, 0.0 }
 0x119   : > { %v597_v59 = vpop.f32.mrb[18].mxu0  ;;  %1152 = vmatprep.subr.bf16.mxu1 %v1151_v51  ;;  %v655_v1 = vmax.f32 %v594_v57, 0.0 }
 0x11a   : > { %v598_v60 = vadd.f32 %v597_v59, %v389_v56  ;;  %v599_v61 = vpop.f32.mrb[19].mxu0  ;;  %1154 = vmatpush1.bf16.msra.mxu1 %v1153_v48 }
 0x11b   : > { %v600_v62 = vadd.f32 %v599_v61, %v389_v56 }
 0x11c   : > { %v656_v0 = vmax.f32 %v598_v60, 0.0 }
 0x11d   : > { %v657_v2 = vmax.f32 %v600_v62, 0.0  ;;  %v603_v3 = vpop.f32.mrb[20].mxu0  ;;  %v670_v62 = vld [vmem:[%s1572_s3] sm:$0xff] }
 0x11e   : > { %v1157_v6 = vpack.c.bf16 %v656_v0, %v654_v63  ;;  %v605_v9 = vpop.f32.mrb[21].mxu0  ;;  %v604_v13 = vadd.f32 %v603_v3, %v394_v11  ;;  %v671_v63 = vld [vmem:[%s1572_s3 + $0x8] sm:$0xff]  ;;  %v672_v0 = vld [vmem:[%s1572_s3 + $0x10] sm:$0xff] }
 0x11f   : > { %v1155_v12 = vpack.c.bf16 %v657_v2, %v655_v1  ;;  %v606_v15 = vadd.f32 %v605_v9, %v394_v11  ;;  %v673_v1 = vld [vmem:[%s1572_s3 + $0x18] sm:$0xff]  ;;  %v681_v11 = vpop.permute.xlu0 %680 }
 0x120   : > { %v658_v20 = vmax.f32 %v604_v13, 0.0 }
 0x121   : > { %v609_v16 = vpop.f32.mrb[22].mxu0  ;;  %1156 = vmatprep.subr.bf16.mxu1 %v1155_v12  ;;  %v659_v22 = vmax.f32 %v606_v15, 0.0 }
 0x122   : > { %v610_v17 = vadd.f32 %v609_v16, %v399_v14  ;;  %v611_v18 = vpop.f32.mrb[23].mxu0  ;;  %1158 = vmatpush1.bf16.msra.mxu1 %v1157_v6  ;;  %v686_v6 = vpop.permute.xlu1 %685 }
 0x123   : > { %v612_v19 = vadd.f32 %v611_v18, %v399_v14 }
 0x124   : > { %v660_v21 = vmax.f32 %v610_v17, 0.0 }
 0x125   : > { %v661_v23 = vmax.f32 %v612_v19, 0.0  ;;  %v615_v24 = vpop.f32.mrb[24].mxu0  ;;  %v787_v19 = vld [vmem:[%s1574_s5] sm:$0xff] }
 0x126   : > { %v1161_v25 = vpack.c.bf16 %v660_v21, %v658_v20  ;;  %v617_v26 = vpop.f32.mrb[25].mxu0  ;;  %v616_v29 = vadd.f32 %v615_v24, %v404_v27  ;;  %v788_v20 = vld [vmem:[%s1574_s5 + $0x8] sm:$0xff]  ;;  %v789_v21 = vld [vmem:[%s1574_s5 + $0x10] sm:$0xff] }
 0x127   : > { %v1159_v28 = vpack.c.bf16 %v661_v23, %v659_v22  ;;  %v618_v31 = vadd.f32 %v617_v26, %v404_v27  ;;  %v790_v22 = vld [vmem:[%s1574_s5 + $0x18] sm:$0xff] }
 0x128   : > { %v662_v36 = vmax.f32 %v616_v29, 0.0 }
 0x129   : > { %v621_v32 = vpop.f32.mrb[26].mxu0  ;;  %1160 = vmatprep.subr.bf16.mxu1 %v1159_v28  ;;  %v663_v38 = vmax.f32 %v618_v31, 0.0 }
 0x12a   : > { %v622_v33 = vadd.f32 %v621_v32, %v409_v30  ;;  %v623_v34 = vpop.f32.mrb[27].mxu0  ;;  %1162 = vmatpush1.bf16.msra.mxu1 %v1161_v25 }
 0x12b   : > { %v624_v35 = vadd.f32 %v623_v34, %v409_v30 }
 0x12c   : > { %v664_v37 = vmax.f32 %v622_v33, 0.0 }
 0x12d   : > { %v665_v39 = vmax.f32 %v624_v35, 0.0  ;;  %v627_v40 = vpop.f32.mrb[28].mxu0 }
 0x12e   : > { %v1165_v41 = vpack.c.bf16 %v664_v37, %v662_v36  ;;  %v629_v42 = vpop.f32.mrb[29].mxu0  ;;  %v628_v45 = vadd.f32 %v627_v40, %v414_v43 }
 0x12f   : > { %v1163_v44 = vpack.c.bf16 %v665_v39, %v663_v38  ;;  %v630_v47 = vadd.f32 %v629_v42, %v414_v43 }
 0x130   : > { %v666_v53 = vmax.f32 %v628_v45, 0.0 }
 0x131   : > { %v633_v48 = vpop.f32.mrb[30].mxu0  ;;  %1164 = vmatprep.subr.bf16.mxu1 %v1163_v44  ;;  %v667_v57 = vmax.f32 %v630_v47, 0.0  ;;  %v691_v47 = vpop.permute.xlu0 %690 }
 0x132   : > { %v634_v49 = vadd.f32 %v633_v48, %v419_v46  ;;  %v635_v50 = vpop.f32.mrb[31].mxu0  ;;  %1166 = vmatpush1.bf16.msra.mxu1 %v1165_v41 }
 0x133   : > { %v636_v51 = vadd.f32 %v635_v50, %v419_v46 }
 0x134   : > { %v668_v56 = vmax.f32 %v634_v49, 0.0  ;;  %v696_v49 = vpop.permute.xlu1 %695 }
 0x135   : > { %v669_v59 = vmax.f32 %v636_v51, 0.0 }
 0x136   : > { %v1169_v60 = vpack.c.bf16 %v668_v56, %v666_v53 }
 0x137   : > { %v1167_v61 = vpack.c.bf16 %v669_v59, %v667_v57 }
 0x139   : > { %1168 = vmatprep.subr.bf16.mxu1 %v1167_v61 }
 0x13a   : > { %1170 = vmatpush1.bf16.msra.mxu1 %v1169_v60 }
 0x13d   : > { %763 = vmatmul.mubr.f32.vlgmr.msra.gmra.mrb[0].mxu1 %v670_v62 }
 0x13e   : > { %768 = vmatprep.mubr.f32.mxu1 %v1245_v4 }
 0x141   : > { %769 = vmatmul.mubr.f32.gmra.mrb[2].mxu1 %v671_v63 }
 0x142   : > { %774 = vmatprep.mubr.f32.mxu1 %v1245_v4 }
 0x145   : > { %775 = vmatmul.mubr.f32.gmra.mrb[4].mxu1 %v672_v0 }
 0x146   : > { %780 = vmatprep.mubr.f32.mxu1 %v1245_v4 }
 0x149   : > { %781 = vmatmul.mubr.f32.gmra.mrb[6].mxu1 %v673_v1 }
 0x14a   : > { %868 = vmatprep.mubr.f32.mxu1 %v1245_v4 }
 0x210   : > { %v764_v2 = vpop.f32.mrb[0].mxu1 }
 0x211   : > { %v766_v3 = vpop.f32.mrb[1].mxu1  ;;  %v1513_v16 = vadd.f32 %v764_v2, %v681_v11 }
 0x212   : > { %v1509_v14 = vadd.f32 %v766_v3, %v681_v11  ;;  %v1023_v11 = vlaneseq }
 0x214   : > { %v770_v9 = vpop.f32.mrb[2].mxu1  ;;  %vm1037_vm6 = vcmp.lt.s32.totalorder %v1023_v11, 256 }
 0x215   : > { %v1507_v12 = vadd.f32 %v770_v9, %v686_v6  ;;  %v772_v13 = vpop.f32.mrb[3].mxu1 }
 0x216   : > { %v1511_v15 = vadd.f32 %v772_v13, %v686_v6  ;;  %v1248_v6 = vmov 1966171168  }
 0x217   : > { %v1173_v18 = vpack.c.bf16 %v1507_v12, %v1513_v16  ;;  %v1021_v9 = vunpack.c.l.s4 %v1248_v6 }
 0x218   : > { %v1171_v17 = vpack.c.bf16 %v1511_v15, %v1509_v14 }
 0x21a   : > { %1172 = vmatprep.subr.bf16.mxu1 %v1171_v17 }
 0x21b   : > { %1174 = vmatpush1.bf16.msra.mxu1 %v1173_v18 }
 0x21e   : > { %1124 = vmatmul.mubr.msk.f32.vlgmr.msra.gmra.mrb[8].mxu1 %vm791_vm4, %v787_v19  ;;  %v1024_v19 = vshrl.u32 %v1023_v11, 7 }
 0x21f   : > { %874 = vmatprep.mubr.f32.mxu1 %v1245_v4 }
 0x222   : > { %1125 = vmatmul.mubr.msk.f32.gmra.mrb[10].mxu1 %vm791_vm4, %v788_v20 }
 0x223   : > { %880 = vmatprep.mubr.f32.mxu1 %v1245_v4 }
 0x226   : > { %1126 = vmatmul.mubr.msk.f32.gmra.mrb[12].mxu1 %vm791_vm4, %v789_v21 }
 0x227   : > { %886 = vmatprep.mubr.f32.mxu1 %v1245_v4 }
 0x22a   : > { %1127 = vmatmul.mubr.msk.f32.gmra.mrb[14].mxu1 %vm791_vm4, %v790_v22 }
 0x22b   : > { %982 = vmatprep.mubr.f32.mxu1 %v1245_v4 }
 0x2f1   : > { %v870_v23 = vpop.f32.mrb[8].mxu1 }
 0x2f2   : > { %v872_v24 = vpop.f32.mrb[9].mxu1  ;;  %v893_v25 = vadd.f32 %v870_v23, %v1469_v54 }
 0x2f3   : > { %v894_v26 = vadd.f32 %v872_v24, %v1467_v52 }
 0x2f4   : > { %v901_v31 = vmax.f32 %v893_v25, 0.0 }
 0x2f5   : > { %v876_v27 = vpop.f32.mrb[10].mxu1  ;;  %v902_v33 = vmax.f32 %v894_v26, 0.0 }
 0x2f6   : > { %v895_v28 = vadd.f32 %v876_v27, %v1471_v55  ;;  %v878_v29 = vpop.f32.mrb[11].mxu1 }
 0x2f7   : > { %v896_v30 = vadd.f32 %v878_v29, %v1473_v58 }
 0x2f8   : > { %v903_v32 = vmax.f32 %v895_v28, 0.0 }
 0x2f9   : > { %v904_v34 = vmax.f32 %v896_v30, 0.0  ;;  %v882_v35 = vpop.f32.mrb[12].mxu1 }
 0x2fa   : > { %v1177_v36 = vpack.c.bf16 %v903_v32, %v901_v31  ;;  %v884_v37 = vpop.f32.mrb[13].mxu1  ;;  %v897_v39 = vadd.f32 %v882_v35, %v1481_v7  ;;  %v910_v7 = vld [vmem:[%s1575_s6 + $0x8] sm:$0xff] }
 0x2fb   : > { %v1175_v38 = vpack.c.bf16 %v904_v34, %v902_v33  ;;  %v898_v54 = vadd.f32 %v884_v37, %v1479_v5  ;;  %v909_v5 = vld [vmem:[%s1575_s6] sm:$0xff] }
 0x2fc   : > { %v905_v41 = vmax.f32 %v897_v39, 0.0 }
 0x2fd   : > { %v888_v40 = vpop.f32.mrb[14].mxu1  ;;  %1176 = vmatprep.subr.bf16.mxu1 %v1175_v38  ;;  %v906_v43 = vmax.f32 %v898_v54, 0.0 }
 0x2fe   : > { %v899_v52 = vadd.f32 %v888_v40, %v1483_v8  ;;  %v890_v55 = vpop.f32.mrb[15].mxu1  ;;  %1178 = vmatpush1.bf16.msra.mxu1 %v1177_v36 }
 0x2ff   : > { %v900_v58 = vadd.f32 %v890_v55, %v1485_v10 }
 0x300   : > { %v907_v42 = vmax.f32 %v899_v52, 0.0 }
 0x301   : > { %v908_v44 = vmax.f32 %v900_v58, 0.0 }
 0x302   : > { %v1181_v45 = vpack.c.bf16 %v907_v42, %v905_v41 }
 0x303   : > { %v1179_v46 = vpack.c.bf16 %v908_v44, %v906_v43 }
 0x305   : > { %1180 = vmatprep.subr.bf16.mxu1 %v1179_v46 }
 0x306   : > { %1182 = vmatpush1.bf16.msra.mxu1 %v1181_v45 }
 0x309   : > { %1128 = vmatmul.mubr.msk.f32.vlgmr.msra.gmra.mrb[4].mxu1 %vm911_vm5, %v909_v5 }
 0x30a   : > { %988 = vmatprep.mubr.f32.mxu1 %v1245_v4 }
 0x30d   : > { %1129 = vmatmul.mubr.msk.f32.gmra.mrb[6].mxu1 %vm911_vm5, %v910_v7 }
 0x3dc   : > { %v984_v8 = vpop.f32.mrb[4].mxu1 }
 0x3dd   : > { %v986_v10 = vpop.f32.mrb[5].mxu1  ;;  %v1183_v48 = vadd.f32 %v984_v8, %v691_v47 }
 0x3de   : > { %v1184_v50 = vadd.f32 %v986_v10, %v691_v47 }
 0x3df   : > { %v999_v59 = vmul.f32 %v1183_v48, %v1513_v16 }
 0x3e0   : > { %v990_v51 = vpop.f32.mrb[6].mxu1  ;;  %v1000_v60 = vmul.f32 %v1184_v50, %v1509_v14 }
 0x3e1   : > { %v1185_v53 = vadd.f32 %v990_v51, %v696_v49  ;;  %v992_v56 = vpop.f32.mrb[7].mxu1 }
 0x3e2   : > { %v1186_v57 = vadd.f32 %v992_v56, %v696_v49 }
 0x3e3   : > { %v1001_v4 = vmul.f32 %v1185_v53, %v1507_v12  ;;  %v1022_v12 = vunpack.c.0.s8 %v1021_v9 }
 0x3e4   : > { %v1002_v61 = vmul.f32 %v1186_v57, %v1511_v15 }
 0x3e5   : > { %v1003_v62 = vadd.f32 %v1001_v4, %v999_v59  ;;  %v1025_v22 = vsub.s32 %v1022_v12, %v1024_v19 }
 0x3e6   : > { %v1010_v63 = vadd.f32 %v1002_v61, %v1000_v60 }
 0x3e7   : > { %v1004_v0 = vrot.slane %v1003_v62, 4 }
 0x3e8   : > { %v1011_v1 = vrot.slane %v1010_v63, 4 }
 0x3e9   : > { %v1005_v2 = vadd.f32 %v1004_v0, %v1003_v62 }
 0x3ea   : > { %v1012_v3 = vadd.f32 %v1011_v1, %v1010_v63 }
 0x3eb   : > { %v1006_v13 = vrot.slane %v1005_v2, 2 }
 0x3ec   : > { %v1013_v17 = vrot.slane %v1012_v3, 2 }
 0x3ed   : > { %v1007_v16 = vadd.f32 %v1006_v13, %v1005_v2 }
 0x3ee   : > { %v1014_v18 = vadd.f32 %v1013_v17, %v1012_v3 }
 0x3ef   : > { %v1008_v14 = vrot.slane %v1007_v16, 1 }
 0x3f0   : > { %v1015_v15 = vrot.slane %v1014_v18, 1 }
 0x3f1   : > { %v1009_v20 = vadd.f32 %v1008_v14, %v1007_v16 }
 0x3f2   : > { %v1016_v21 = vadd.f32 %v1015_v15, %v1014_v18 }
 0x3f4   : > { %v1019_v23 = vcombine.low %v1009_v20, %v1016_v21 }
 0x3f6   : > { %v1026_v24 = vrot.slane %v1019_v23, %v1025_v22 }
 0x3f8   : > { %v1033_v25 = vrot.slane %v1026_v24, %v1025_v22 }
 0x3fa   : > { %1039 = vst.msk [vmem:[%s303_s24] sm:$0x3] %vm1037_vm6, %v1033_v25 }
 0x3fb PF: > { %p14_p9 = scmp.ge.s32.totalorder %s1306_s28, 6   ;;  %s1577_s24 = smov %s1239_s25 }
 0x3fc   : > { %s1578_s25 = smov %s1315_s8  ;;  %s1579_s26 = smov %s1306_s28 }
 0x3fd   :  { %16 = sbr.rel (!%p14_p9) target bundleno = 2 (0x2), region = 106 }

</bundles_post_ra>
